<compile_context>
chip_gen: v7x
topology: tpu7x:2x2x1
jax: 0.10.0
libtpu: 0.0.40
codegen_flags: <defaults>
</compile_context>

<pallas_src>
import math

import jax
import jax.numpy as jnp
from jax.experimental import pallas as pl
from jax.experimental.pallas import tpu as pltpu

LANE = 128                       # lane width (last-dim alignment for padded hidden dims)
SUBLANE = 8                      # sublane width (batch-tile alignment)
TB_MAX = 1024                    # max batch-tile rows (>= ~85% of HBM roofline per sweep)
VMEM_LIMIT_BYTES = 32 * 1024 * 1024   # >= v6e/v7x default scope, raises v5e's 16 MiB default
BN_EPS = 1e-5


def _round_up(n, m):
    return ((n + m - 1) // m) * m


def _pick_batch_tile(batch):
    """512-1024 row tiles when the batch is large; keep >=2 grid steps whenever
    possible so both TensorCores get work on v7x (no effect on v5e/v6e)."""
    if batch <= SUBLANE:
        return SUBLANE
    num_tiles = max(2, math.ceil(batch / TB_MAX))
    return _round_up(math.ceil(batch / num_tiles), SUBLANE)


# -----------------------------------------------------------------------------
# Fused kernel: the whole MLP in one body.
# refs = (x_ref, [w, scale, shift] * num_hidden, [w_out, b_out]?, o_ref)
# -----------------------------------------------------------------------------
def _make_mlp_kernel(num_hidden, has_output, out_dim):
    def kernel(*refs):
        x_ref = refs[0]
        o_ref = refs[-1]
        # In-kernel bf16 cast (free filler under DMA/MXU) -> no wrapper cast pass.
        h = x_ref[...].astype(jnp.bfloat16)
        y = None
        idx = 1
        for _ in range(num_hidden):
            w_ref, scale_ref, shift_ref = refs[idx], refs[idx + 1], refs[idx + 2]
            idx += 3
            acc = jnp.dot(h, w_ref[...], preferred_element_type=jnp.float32)  # MXU, f32 acc
            # Folded eval-mode BatchNorm + Linear bias, then ReLU (Dropout == identity).
            y = jnp.maximum(acc * scale_ref[...] + shift_ref[...], 0.0)
            h = y.astype(jnp.bfloat16)
        if has_output:
            w_ref, b_ref = refs[idx], refs[idx + 1]
            y = jnp.dot(h, w_ref[...], preferred_element_type=jnp.float32) + b_ref[...]
        # Store only the true output columns (out_dim=1 for the final Linear):
        # shrinks the output DMA from a 128-lane slab to the useful bytes.
        o_ref[...] = y[:, :out_dim].astype(o_ref.dtype)

    return kernel


# -----------------------------------------------------------------------------
# Parameter construction (PyTorch-equivalent shapes, f32) and packing for kernel
# -----------------------------------------------------------------------------
def init_mlp_params(key, input_dim, embed_dims, output_layer=True):
    """Deterministic synthetic parameters matching the PyTorch module's shapes."""
    params = []
    d_in = input_dim
    for d_out in embed_dims:
        key, k_w, k_b, k_g, k_bt, k_m, k_v = jax.random.split(key, 7)
        params.append(dict(
            kind="hidden",
            w=jax.random.normal(k_w, (d_in, d_out), jnp.float32) * 0.05,       # Linear.weight^T
            b=jax.random.normal(k_b, (d_out,), jnp.float32) * 0.05,            # Linear.bias
            gamma=1.0 + 0.1 * jax.random.normal(k_g, (d_out,), jnp.float32),   # BN.weight
            beta=0.1 * jax.random.normal(k_bt, (d_out,), jnp.float32),         # BN.bias
            mean=0.1 * jax.random.normal(k_m, (d_out,), jnp.float32),          # BN.running_mean
            var=1.0 + 0.1 * jax.random.uniform(k_v, (d_out,), jnp.float32),    # BN.running_var
        ))
        d_in = d_out
    if output_layer:
        key, k_w, k_b = jax.random.split(key, 3)
        params.append(dict(
            kind="output",
            w=jax.random.normal(k_w, (d_in, 1), jnp.float32) * 0.05,
            b=jax.random.normal(k_b, (1,), jnp.float32) * 0.05,
        ))
    return params


def pack_params_for_kernel(params, input_dim):
    """Fold eval-mode BN + bias into scale/shift, zero-pad hidden widths to 128,
    pre-cast matmul weights to bf16.  The first layer's K stays at the true
    input_dim so x needs no feature padding in HBM."""
    assert params, "MLP must contain at least one layer"
    layers = []
    d_prev = input_dim
    out_dim = input_dim
    for layer in params:
        d_in, d_out = layer["w"].shape
        d_out_pad = _round_up(d_out, LANE)
        w_p = (jnp.zeros((d_prev, d_out_pad), jnp.bfloat16)
               .at[:d_in, :d_out].set(layer["w"].astype(jnp.bfloat16)))
        if layer["kind"] == "hidden":
            #   y = ((x@W + b) - mean)/sqrt(var+eps)*gamma + beta = (x@W)*scale + shift
            scale = layer["gamma"] / jnp.sqrt(layer["var"] + BN_EPS)
            shift = (layer["b"] - layer["mean"]) * scale + layer["beta"]
            scale_p = jnp.ones((1, d_out_pad), jnp.float32).at[0, :d_out].set(scale)
            shift_p = jnp.zeros((1, d_out_pad), jnp.float32).at[0, :d_out].set(shift)
            layers.append(dict(kind="hidden", w=w_p, scale=scale_p, shift=shift_p))
        else:
            b_p = jnp.zeros((1, d_out_pad), jnp.float32).at[0, :d_out].set(layer["b"])
            layers.append(dict(kind="output", w=w_p, b=b_p))
        d_prev = d_out_pad
        out_dim = d_out
    return dict(layers=layers, out_dim=out_dim)


# -----------------------------------------------------------------------------
# Wrapper: build specs and launch the single fused pallas_call (no wrapper ops)
# -----------------------------------------------------------------------------
def mlp_forward(x, packed, *, training=False):
    if training:
        raise NotImplementedError(
            "TODO(synk): training-mode BatchNorm (batch statistics) / stochastic "
            "Dropout not implemented; this kernel matches module.eval() only.")
    B, D_in = x.shape
    layers = packed["layers"]
    out_dim = packed["out_dim"]

    TB = _pick_batch_tile(B)
    grid = (pl.cdiv(B, TB),)          # partial last tile is handled (masked writes)

    inputs = [x]
    # x at native dtype/width: last block dim == full array dim is legal, so no
    # 128-lane padding and no extra pad/cast launch in the wrapper.
    in_specs = [pl.BlockSpec((TB, D_in), lambda i: (i, 0))]
    num_hidden, has_output = 0, False
    for layer in layers:
        if layer["kind"] == "hidden":
            num_hidden += 1
            operands = (layer["w"], layer["scale"], layer["shift"])
        else:
            has_output = True
            operands = (layer["w"], layer["b"])
        for a in operands:
            inputs.append(a)
            # Constant index_map -> parameters stay resident in VMEM across all steps.
            in_specs.append(pl.BlockSpec(a.shape, lambda i: (0, 0)))

    # VMEM budget for the fully-resident-weight strategy (params are double-buffered
    # by default; tiles double-buffered; a few f32 intermediates live at once).
    param_bytes = sum(a.size * a.dtype.itemsize
                      for l in layers for k, a in l.items() if k != "kind")
    max_width = max(l["w"].shape[1] for l in layers)
    need = (2 * param_bytes
            + 2 * TB * D_in * x.dtype.itemsize
            + 2 * TB * out_dim * 4
            + 3 * TB * max_width * 4)
    # TODO(synk): fall back to pltpu.emit_pipeline over the hidden (K/N) dims if the
    # layer stack ever outgrows scoped VMEM (v7x: 64 MiB physical / 32 MiB scoped).
    assert need < 0.75 * VMEM_LIMIT_BYTES, (
        "resident-weight MLP kernel would not fit scoped VMEM", need)

    kernel = _make_mlp_kernel(num_hidden, has_output, out_dim)
    return pl.pallas_call(
        kernel,
        out_shape=jax.ShapeDtypeStruct((B, out_dim), jnp.float32),
        grid=grid,
        in_specs=in_specs,
        out_specs=pl.BlockSpec((TB, out_dim), lambda i: (i, 0)),
        compiler_params=pltpu.CompilerParams(
            dimension_semantics=("parallel",),
            vmem_limit_bytes=VMEM_LIMIT_BYTES),
    )(*inputs)


# -----------------------------------------------------------------------------
# Pure-JAX reference (explicit Linear -> eval-BN -> ReLU -> [Dropout=id]) in f32
# -----------------------------------------------------------------------------
def mlp_reference(x, params):
    h = x
    for layer in params:
        if layer["kind"] == "hidden":
            h = h @ layer["w"] + layer["b"]
            h = (h - layer["mean"]) / jnp.sqrt(layer["var"] + BN_EPS) * layer["gamma"] + layer["beta"]
            h = jnp.maximum(h, 0.0)          # Dropout is identity in eval mode
        else:
            h = h @ layer["w"] + layer["b"]
    return h


if __name__ == "__main__":
    key = jax.random.PRNGKey(0)
    batch, input_dim, embed_dims = 8, 32, (64, 32)

    key, k_x, k_p = jax.random.split(key, 3)
    x = jax.random.normal(k_x, (batch, input_dim), jnp.float32)
    params = init_mlp_params(k_p, input_dim, embed_dims, output_layer=True)
    packed = pack_params_for_kernel(params, input_dim)

    # Jit the whole forward so dispatch + the single custom call compile together.
    fwd = jax.jit(lambda xx: mlp_forward(xx, packed))

    out = jax.block_until_ready(fwd(x))
    ref = mlp_reference(x, params)
    assert out.shape == (batch, 1), out.shape
    # bf16 matmul operands -> looser tolerance than pure f32.
    assert jnp.allclose(out, ref, atol=2e-2, rtol=2e-2), (
        "mismatch vs reference", float(jnp.max(jnp.abs(out - ref))))

    # Multi-tile grid (>= 2 steps, partial last tile) path as well.
    key, k_x2 = jax.random.split(key)
    x2 = jax.random.normal(k_x2, (260, input_dim), jnp.float32)
    out2 = jax.block_until_ready(fwd(x2))
    ref2 = mlp_reference(x2, params)
    assert out2.shape == (260, 1), out2.shape
    assert jnp.allclose(out2, ref2, atol=2e-2, rtol=2e-2), (
        "mismatch vs reference (tiled)", float(jnp.max(jnp.abs(out2 - ref2))))

    print("KERNEL_OK")
</pallas_src>

<mosaic_0001>
module attributes {stable_mosaic.version = 11 : i64} {
  func.func @kernel(%arg0: i32, %arg1: memref<8x32xf32, #tpu.memory_space<vmem>>, %arg2: memref<32x128xbf16, #tpu.memory_space<vmem>>, %arg3: memref<1x128xf32, #tpu.memory_space<vmem>>, %arg4: memref<1x128xf32, #tpu.memory_space<vmem>>, %arg5: memref<128x128xbf16, #tpu.memory_space<vmem>>, %arg6: memref<1x128xf32, #tpu.memory_space<vmem>>, %arg7: memref<1x128xf32, #tpu.memory_space<vmem>>, %arg8: memref<128x128xbf16, #tpu.memory_space<vmem>>, %arg9: memref<1x128xf32, #tpu.memory_space<vmem>>, %arg10: memref<8x1xf32, #tpu.memory_space<vmem>>) attributes {dimension_semantics = [#tpu.dimension_semantics<parallel>], iteration_bounds = array<i64: 1>, scalar_prefetch = 0 : i64, scratch_operands = 0 : i64, tpu.core_type = #tpu.core_type<tc>, window_params = [{transform_indices = @transform_0, window_bounds = array<i64: 8, 32>}, {pipeline_mode = #tpu.pipeline_mode<synchronous>, transform_indices = @transform_1, window_bounds = array<i64: 32, 128>}, {pipeline_mode = #tpu.pipeline_mode<synchronous>, transform_indices = @transform_2, window_bounds = array<i64: 1, 128>}, {pipeline_mode = #tpu.pipeline_mode<synchronous>, transform_indices = @transform_3, window_bounds = array<i64: 1, 128>}, {pipeline_mode = #tpu.pipeline_mode<synchronous>, transform_indices = @transform_4, window_bounds = array<i64: 128, 128>}, {pipeline_mode = #tpu.pipeline_mode<synchronous>, transform_indices = @transform_5, window_bounds = array<i64: 1, 128>}, {pipeline_mode = #tpu.pipeline_mode<synchronous>, transform_indices = @transform_6, window_bounds = array<i64: 1, 128>}, {pipeline_mode = #tpu.pipeline_mode<synchronous>, transform_indices = @transform_7, window_bounds = array<i64: 128, 128>}, {pipeline_mode = #tpu.pipeline_mode<synchronous>, transform_indices = @transform_8, window_bounds = array<i64: 1, 128>}, {transform_indices = @transform_9, window_bounds = array<i64: 8, 1>}]} {
    %c0 = arith.constant 0 : index
    %c0_0 = arith.constant 0 : index
    %0 = vector.load %arg1[%c0, %c0_0] : memref<8x32xf32, #tpu.memory_space<vmem>>, vector<8x32xf32>
    %1 = arith.truncf %0 : vector<8x32xf32> to vector<8x32xbf16>
    %c0_1 = arith.constant 0 : index
    %c0_2 = arith.constant 0 : index
    %2 = vector.load %arg2[%c0_1, %c0_2] : memref<32x128xbf16, #tpu.memory_space<vmem>>, vector<32x128xbf16>
    %cst = arith.constant dense<0.000000e+00> : vector<8x128xf32>
    %3 = tpu.matmul %1, %2, %cst {dimension_numbers = #tpu.dot_dimension_numbers<[1], [0], [0], [1], [0, 0, 1, 1], [], []>} : vector<8x32xbf16>, vector<32x128xbf16>, vector<8x128xf32> -> vector<8x128xf32>
    %c0_3 = arith.constant 0 : index
    %c0_4 = arith.constant 0 : index
    %4 = vector.load %arg3[%c0_3, %c0_4] : memref<1x128xf32, #tpu.memory_space<vmem>>, vector<1x128xf32>
    %5 = vector.broadcast %4 : vector<1x128xf32> to vector<8x128xf32>
    %6 = arith.mulf %3, %5 : vector<8x128xf32>
    %c0_5 = arith.constant 0 : index
    %c0_6 = arith.constant 0 : index
    %7 = vector.load %arg4[%c0_5, %c0_6] : memref<1x128xf32, #tpu.memory_space<vmem>>, vector<1x128xf32>
    %8 = vector.broadcast %7 : vector<1x128xf32> to vector<8x128xf32>
    %9 = arith.addf %6, %8 : vector<8x128xf32>
    %cst_7 = arith.constant 0.000000e+00 : f32
    %10 = vector.broadcast %cst_7 : f32 to vector<8x128xf32>
    %11 = arith.maximumf %9, %10 : vector<8x128xf32>
    %12 = arith.truncf %11 : vector<8x128xf32> to vector<8x128xbf16>
    %c0_8 = arith.constant 0 : index
    %c0_9 = arith.constant 0 : index
    %13 = vector.load %arg5[%c0_8, %c0_9] : memref<128x128xbf16, #tpu.memory_space<vmem>>, vector<128x128xbf16>
    %cst_10 = arith.constant dense<0.000000e+00> : vector<8x128xf32>
    %14 = tpu.matmul %12, %13, %cst_10 {dimension_numbers = #tpu.dot_dimension_numbers<[1], [0], [0], [1], [0, 0, 1, 1], [], []>} : vector<8x128xbf16>, vector<128x128xbf16>, vector<8x128xf32> -> vector<8x128xf32>
    %c0_11 = arith.constant 0 : index
    %c0_12 = arith.constant 0 : index
    %15 = vector.load %arg6[%c0_11, %c0_12] : memref<1x128xf32, #tpu.memory_space<vmem>>, vector<1x128xf32>
    %16 = vector.broadcast %15 : vector<1x128xf32> to vector<8x128xf32>
    %17 = arith.mulf %14, %16 : vector<8x128xf32>
    %c0_13 = arith.constant 0 : index
    %c0_14 = arith.constant 0 : index
    %18 = vector.load %arg7[%c0_13, %c0_14] : memref<1x128xf32, #tpu.memory_space<vmem>>, vector<1x128xf32>
    %19 = vector.broadcast %18 : vector<1x128xf32> to vector<8x128xf32>
    %20 = arith.addf %17, %19 : vector<8x128xf32>
    %cst_15 = arith.constant 0.000000e+00 : f32
    %21 = vector.broadcast %cst_15 : f32 to vector<8x128xf32>
    %22 = arith.maximumf %20, %21 : vector<8x128xf32>
    %23 = arith.truncf %22 : vector<8x128xf32> to vector<8x128xbf16>
    %c0_16 = arith.constant 0 : index
    %c0_17 = arith.constant 0 : index
    %24 = vector.load %arg8[%c0_16, %c0_17] : memref<128x128xbf16, #tpu.memory_space<vmem>>, vector<128x128xbf16>
    %cst_18 = arith.constant dense<0.000000e+00> : vector<8x128xf32>
    %25 = tpu.matmul %23, %24, %cst_18 {dimension_numbers = #tpu.dot_dimension_numbers<[1], [0], [0], [1], [0, 0, 1, 1], [], []>} : vector<8x128xbf16>, vector<128x128xbf16>, vector<8x128xf32> -> vector<8x128xf32>
    %c0_19 = arith.constant 0 : index
    %c0_20 = arith.constant 0 : index
    %26 = vector.load %arg9[%c0_19, %c0_20] : memref<1x128xf32, #tpu.memory_space<vmem>>, vector<1x128xf32>
    %27 = vector.broadcast %26 : vector<1x128xf32> to vector<8x128xf32>
    %28 = arith.addf %25, %27 : vector<8x128xf32>
    %29 = vector.extract_strided_slice %28 {offsets = [0, 0], sizes = [8, 1], strides = [1, 1]} : vector<8x128xf32> to vector<8x1xf32>
    %c0_21 = arith.constant 0 : index
    %c0_22 = arith.constant 0 : index
    %30 = vector.load %arg10[%c0_21, %c0_22] : memref<8x1xf32, #tpu.memory_space<vmem>>, vector<8x1xf32>
    tpu.vector_store %arg10[%c0_21, %c0_22], %29 {strides = array<i32>} : memref<8x1xf32, #tpu.memory_space<vmem>>, vector<8x1xf32>,
    return
  }
  func.func @transform_0(%arg0: i32) -> (i32, i32) {
    %c0_i32 = arith.constant 0 : i32
    %c0_i32_0 = arith.constant 0 : i32
    return %arg0, %c0_i32 : i32, i32
  }
  func.func @transform_1(%arg0: i32) -> (i32, i32) {
    %c0_i32 = arith.constant 0 : i32
    %c0_i32_0 = arith.constant 0 : i32
    %c0_i32_1 = arith.constant 0 : i32
    return %c0_i32, %c0_i32_0 : i32, i32
  }
  func.func @transform_2(%arg0: i32) -> (i32, i32) {
    %c0_i32 = arith.constant 0 : i32
    %c0_i32_0 = arith.constant 0 : i32
    %c0_i32_1 = arith.constant 0 : i32
    return %c0_i32, %c0_i32_0 : i32, i32
  }
  func.func @transform_3(%arg0: i32) -> (i32, i32) {
    %c0_i32 = arith.constant 0 : i32
    %c0_i32_0 = arith.constant 0 : i32
    %c0_i32_1 = arith.constant 0 : i32
    return %c0_i32, %c0_i32_0 : i32, i32
  }
  func.func @transform_4(%arg0: i32) -> (i32, i32) {
    %c0_i32 = arith.constant 0 : i32
    %c0_i32_0 = arith.constant 0 : i32
    %c0_i32_1 = arith.constant 0 : i32
    return %c0_i32, %c0_i32_0 : i32, i32
  }
  func.func @transform_5(%arg0: i32) -> (i32, i32) {
    %c0_i32 = arith.constant 0 : i32
    %c0_i32_0 = arith.constant 0 : i32
    %c0_i32_1 = arith.constant 0 : i32
    return %c0_i32, %c0_i32_0 : i32, i32
  }
  func.func @transform_6(%arg0: i32) -> (i32, i32) {
    %c0_i32 = arith.constant 0 : i32
    %c0_i32_0 = arith.constant 0 : i32
    %c0_i32_1 = arith.constant 0 : i32
    return %c0_i32, %c0_i32_0 : i32, i32
  }
  func.func @transform_7(%arg0: i32) -> (i32, i32) {
    %c0_i32 = arith.constant 0 : i32
    %c0_i32_0 = arith.constant 0 : i32
    %c0_i32_1 = arith.constant 0 : i32
    return %c0_i32, %c0_i32_0 : i32, i32
  }
  func.func @transform_8(%arg0: i32) -> (i32, i32) {
    %c0_i32 = arith.constant 0 : i32
    %c0_i32_0 = arith.constant 0 : i32
    %c0_i32_1 = arith.constant 0 : i32
    return %c0_i32, %c0_i32_0 : i32, i32
  }
  func.func @transform_9(%arg0: i32) -> (i32, i32) {
    %c0_i32 = arith.constant 0 : i32
    %c0_i32_0 = arith.constant 0 : i32
    return %arg0, %c0_i32 : i32, i32
  }
}

</mosaic_0001>

<bundles_post_ra>
// kernel: _lambda_.1
= control target key start
LH: loop header
LB: loop body
LE: loop exit
PB: predicated region body
PF: predicated region fallthrough
CT: control target
= control target key end

     0   :  { %14 = vsyncpa [#allocation3], 0  ;;  %s678_s0 = inlined_call_operand.vmem [shape: f32[8,32], index: 0, kind: input, shape index: {}]   ;;  %s679_s1 = inlined_call_operand.vmem [shape: bf16[32,128], index: 1, kind: input, shape index: {}]   ;;  %s680_s2 = inlined_call_operand.vmem [shape: f32[1,128], index: 2, kind: input, shape index: {}]   ;;  %s681_s3 = inlined_call_operand.vmem [shape: f32[1,128], index: 3, kind: input, shape index: {}]   ;;  %s682_s4 = inlined_call_operand.hbm [shape: bf16[128,128], index: 4, kind: input, shape index: {}]   ;;  %s683_s5 = inlined_call_operand.vmem [shape: f32[1,128], index: 5, kind: input, shape index: {}]   ;;  %s684_s6 = inlined_call_operand.vmem [shape: f32[1,128], index: 6, kind: input, shape index: {}]   ;;  %s685_s7 = inlined_call_operand.hbm [shape: bf16[128,128], index: 7, kind: input, shape index: {}]   ;;  %s686_s8 = inlined_call_operand.vmem [shape: f32[1,128], index: 8, kind: input, shape index: {}]   ;;  %s687_s9 = inlined_call_operand.vmem [shape: f32[8,1], index: 9, kind: output, shape index: {}]  }
   0x1   :  { %15 = vsyncpa [#allocation5], 0  ;;  %s547_s30 = smov [#allocation2]   ;;  %s499_s13 = scalar_lea.hbm %s682_s4, 1024 }
   0x2   :  { %s29_s10 = sshll.u32 %s547_s30, 4  ;;  %p500_p0 = scmp.ne.s32.totalorder %s682_s4, %s499_s13  ;;  %s30_s10 = int_to_ptr.vmem [resolvable:$true] %s29_s10 }
   0x3   :  { %p503_p1 = scmp.lt.u32.totalorder %s499_s13, %s682_s4 }
   0x5   :  { %p505_p2 = pnand %p503_p1, %p500_p0 }
   0x7   :  { %508 = shalt.err (!%p505_p2)
}
   0x8   :  { %s509_s18 = scalar_lea.vmem %s30_s10, 1024  ;;  %p514_p4 = scmp.lt.s32.totalorder %s30_s10, %s30_s10 }
   0x9   :  { %p510_p3 = scmp.ne.s32.totalorder %s30_s10, %s509_s18  ;;  %p515_p5 = scmp.lt.s32.totalorder %s509_s18, %s509_s18 }
   0xb   :  { %p516_p6 = por %p515_p5, %p514_p4 }
   0xd   :  { %p517_p7 = pnand %p516_p6, %p510_p3 }
   0xf   :  { %520 = shalt.err (!%p517_p7)
}
  0x10   :  { %s548_s19 = smov 64   ;;  %s549_s20 = smov 4  }
  0x11   :  { %35 = dma.hbm_to_vmem [thread:$0]  %s682_s4, 1024, %s30_s10, [#allocation3], %s548_s19, %s548_s19, %s549_s20  }
  0x12   :  { %s550_s23 = smov [#allocation4]   ;;  %s521_s27 = scalar_lea.hbm %s685_s7, 1024 }
  0x13   :  { %s45_s24 = sshll.u32 %s550_s23, 4  ;;  %p522_p8 = scmp.ne.s32.totalorder %s685_s7, %s521_s27  ;;  %s46_s24 = int_to_ptr.vmem [resolvable:$true] %s45_s24 }
  0x14   :  { %p525_p9 = scmp.lt.u32.totalorder %s521_s27, %s685_s7 }
  0x16   :  { %p527_p10 = pnand %p525_p9, %p522_p8 }
  0x18   :  { %530 = shalt.err (!%p527_p10)
}
  0x19   :  { %s531_s12 = scalar_lea.vmem %s46_s24, 1024  ;;  %p536_p12 = scmp.lt.s32.totalorder %s46_s24, %s46_s24 }
  0x1a   :  { %p532_p11 = scmp.ne.s32.totalorder %s46_s24, %s531_s12  ;;  %p537_p13 = scmp.lt.s32.totalorder %s531_s12, %s531_s12 }
  0x1c   :  { %p538_p0 = por %p537_p13, %p536_p12 }
  0x1e   :  { %p539_p1 = pnand %p538_p0, %p532_p11 }
  0x20   :  { %542 = shalt.err (!%p539_p1)
}
  0x21   :  { %51 = dma.hbm_to_vmem [thread:$0]  %s685_s7, 1024, %s46_s24, [#allocation5], %s548_s19, %s548_s19, %s549_s20  }
  0x22   :  { %543 = dma.done.wait [#allocation3], 1024  }
  0x23   :  { %544 = vsyncadd [#allocation3], 4294966272 }
  0x24   :  { %545 = dma.done.wait [#allocation5], 1024  }
  0x25   :  { %546 = vsyncadd [#allocation5], 4294966272  ;;  %v551_v0 = vmov 0.0   ;;  %vm552_vm0 = vmmov 0   ;;  %v481_v1 = vld [vmem:[%s679_s1] sm:$0xff]   ;;  %v482_v2 = vld [vmem:[%s679_s1 + $0x8] sm:$0xff]  }
  0x26   :  { %427 = vmatprep.subr.bf16.mxu0 %v551_v0  ;;  %431 = vmatprep.mubr.msk.bf16.mxu0 %vm552_vm0, %v551_v0  ;;  %v61_v3 = vld [vmem:[%s678_s0] sm:$0xff]  ;;  %v484_v6 = vld [vmem:[#allocation2 + $0x8] sm:$0xff]   ;;  %vm79_vm1 = vcmask 261120   ;;  %v485_v7 = vld [vmem:[#allocation2 + $0x10] sm:$0xff]   ;;  %vm374_vm2 = vcmask 7168  }
  0x27   :  { %435 = vmatprep.subr.bf16.mxu1 %v551_v0  ;;  %451 = vmatprep.mubr.msk.bf16.mxu1 %vm552_vm0, %v551_v0  ;;  %v483_v4 = vld [vmem:[#allocation2] sm:$0xff]   ;;  %v62_v5 = vpack.c.bf16 %v61_v3, %v61_v3  ;;  %v486_v8 = vld [vmem:[#allocation2 + $0x18] sm:$0xff]   ;;  %v488_v10 = vld [vmem:[#allocation2 + $0x28] sm:$0xff]  }
  0x28   :  { %428 = vmatpush3.bf16.msra.mxu0 %v481_v1  ;;  %436 = vmatpush3.bf16.msra.mxu1 %v483_v4  ;;  %v487_v9 = vld [vmem:[#allocation2 + $0x20] sm:$0xff]   ;;  %v489_v11 = vld [vmem:[#allocation2 + $0x30] sm:$0xff]   ;;  %v490_v12 = vld [vmem:[#allocation2 + $0x38] sm:$0xff]  }
  0x29   :  { %429 = vmatprep.subr.bf16.mxu0 %v551_v0  ;;  %437 = vmatprep.subr.bf16.mxu1 %v551_v0  ;;  %v491_v13 = vld [vmem:[#allocation4] sm:$0xff]   ;;  %v492_v14 = vld [vmem:[#allocation4 + $0x8] sm:$0xff]   ;;  %v493_v15 = vld [vmem:[#allocation4 + $0x10] sm:$0xff]  }
  0x2a   :  { %v494_v16 = vld [vmem:[#allocation4 + $0x18] sm:$0xff]   ;;  %v495_v17 = vld [vmem:[#allocation4 + $0x20] sm:$0xff]   ;;  %v496_v18 = vld [vmem:[#allocation4 + $0x28] sm:$0xff]  }
  0x2b   :  { %v385_v19 = vld [vmem:[%s680_s2] ss:$0 sm:$0xff]  ;;  %v497_v29 = vld [vmem:[#allocation4 + $0x30] sm:$0xff]   ;;  %v498_v30 = vld [vmem:[#allocation4 + $0x38] sm:$0xff]  }
  0x2c   :  { %430 = vmatpush3.bf16.msra.mxu0 %v482_v2  ;;  %438 = vmatpush3.bf16.msra.mxu1 %v484_v6  ;;  %v386_v21 = vld [vmem:[%s681_s3] ss:$0 sm:$0xff] }
  0x2d   :  { %455 = vmatprep.subr.bf16.mxu0 %v551_v0  ;;  %439 = vmatprep.subr.bf16.mxu1 %v551_v0  ;;  %v395_v31 = vld [vmem:[%s683_s5] ss:$0 sm:$0xff] }
  0x2e   :  { %v396_v33 = vld [vmem:[%s684_s6] ss:$0 sm:$0xff] }
  0x2f   :  { %432 = vmatmul.mubr.msk.bf16.vlgmr.msra.gmra.mrb[0].mxu0 %vm79_vm1, %v62_v5  ;;  %v397_v41 = vld [vmem:[%s686_s8] ss:$0 sm:$0xff] }
  0x30   :  { %471 = vmatprep.mubr.msk.bf16.mxu0 %vm552_vm0, %v551_v0  ;;  %440 = vmatpush3.bf16.msra.mxu1 %v485_v7 }
  0x31   :  { %441 = vmatprep.subr.bf16.mxu1 %v551_v0  ;;  %456 = vmatpush3.bf16.msra.mxu0 %v491_v13 }
  0x32   :  { %457 = vmatprep.subr.bf16.mxu0 %v551_v0 }
  0x34   :  { %442 = vmatpush3.bf16.msra.mxu1 %v486_v8 }
  0x35   :  { %443 = vmatprep.subr.bf16.mxu1 %v551_v0  ;;  %458 = vmatpush3.bf16.msra.mxu0 %v492_v14 }
  0x36   :  { %459 = vmatprep.subr.bf16.mxu0 %v551_v0 }
  0x38   :  { %444 = vmatpush3.bf16.msra.mxu1 %v487_v9 }
  0x39   :  { %445 = vmatprep.subr.bf16.mxu1 %v551_v0  ;;  %460 = vmatpush3.bf16.msra.mxu0 %v493_v15 }
  0x3a   :  { %461 = vmatprep.subr.bf16.mxu0 %v551_v0 }
  0x3c   :  { %446 = vmatpush3.bf16.msra.mxu1 %v488_v10 }
  0x3d   :  { %447 = vmatprep.subr.bf16.mxu1 %v551_v0  ;;  %462 = vmatpush3.bf16.msra.mxu0 %v494_v16 }
  0x3e   :  { %463 = vmatprep.subr.bf16.mxu0 %v551_v0 }
  0x40   :  { %448 = vmatpush3.bf16.msra.mxu1 %v489_v11 }
  0x41   :  { %449 = vmatprep.subr.bf16.mxu1 %v551_v0  ;;  %464 = vmatpush3.bf16.msra.mxu0 %v495_v17 }
  0x42   :  { %465 = vmatprep.subr.bf16.mxu0 %v551_v0 }
  0x44   :  { %450 = vmatpush3.bf16.msra.mxu1 %v490_v12 }
  0x45   :  { %466 = vmatpush3.bf16.msra.mxu0 %v496_v18 }
  0x46   :  { %467 = vmatprep.subr.bf16.mxu0 %v551_v0 }
  0x49   :  { %468 = vmatpush3.bf16.msra.mxu0 %v497_v29 }
  0x4a   :  { %469 = vmatprep.subr.bf16.mxu0 %v551_v0 }
  0x4d   :  { %470 = vmatpush3.bf16.msra.mxu0 %v498_v30 }
 0x102   :  { %v117_v20 = vpop.f32.mrb[0].mxu0 }
 0x103   :  { %v130_v22 = vmul.f32 %v385_v19, %v117_v20  ;;  %v433_v23 = vpop.f32.mrb[1].mxu0 }
 0x104   :  { %v120_v24 = vpop.f32.mrb[2].mxu0 }
 0x105   :  { %v138_v25 = vadd.f32 %v386_v21, %v130_v22  ;;  %v434_v26 = vpop.f32.mrb[3].mxu0 }
 0x107   :  { %v139_v27 = vmax.f32 %v138_v25, 0.0 }
 0x109   :  { %v140_v28 = vpack.c.bf16 %v139_v27, %v139_v27 }
 0x10b   :  { %452 = vmatmul.mubr.bf16.vlgmr.msra.gmra.mrb[0].mxu1 %v140_v28 }
 0x1de   :  { %v239_v32 = vpop.f32.mrb[0].mxu1 }
 0x1df   :  { %v252_v34 = vmul.f32 %v395_v31, %v239_v32  ;;  %v453_v35 = vpop.f32.mrb[1].mxu1 }
 0x1e0   :  { %v242_v36 = vpop.f32.mrb[2].mxu1 }
 0x1e1   :  { %v260_v37 = vadd.f32 %v396_v33, %v252_v34  ;;  %v454_v38 = vpop.f32.mrb[3].mxu1 }
 0x1e3   :  { %v261_v39 = vmax.f32 %v260_v37, 0.0 }
 0x1e5   :  { %v262_v40 = vpack.c.bf16 %v261_v39, %v261_v39 }
 0x1e7   :  { %472 = vmatmul.mubr.bf16.vlgmr.msra.gmra.mrb[4].mxu0 %v262_v40 }
 0x2ba   :  { %v368_v42 = vpop.f32.mrb[4].mxu0 }
 0x2bb   :  { %v369_v43 = vadd.f32 %v397_v41, %v368_v42  ;;  %v473_v44 = vpop.f32.mrb[5].mxu0 }
 0x2bc   :  { %v371_v45 = vpop.f32.mrb[6].mxu0 }
 0x2bd   :  { %375 = vst.msk [vmem:[%s687_s9] sm:$0xff] %vm374_vm2, %v369_v43  ;;  %v474_v46 = vpop.f32.mrb[7].mxu0 }
 0x2be   :  { %380 = vsyncpa [#allocation3], 1 }
 0x2bf   :  { %381 = vsyncpa [#allocation5], 1 }

</bundles_post_ra>
